<compile_context>
chip_gen: v6e
topology: v6e:2x2x1
jax: 0.10.0
libtpu: 0.0.40
codegen_flags: <defaults>
</compile_context>

<pallas_src>
import functools
import math

import jax
import jax.numpy as jnp
from jax.experimental import pallas as pl
from jax.experimental.pallas import tpu as pltpu


def _concat_kernel(*refs, offsets, sizes):
    """refs = (*input_refs, out_ref).

    Every ref is a (1, C_i, m_tile) / (1, C_total, m_tile) VMEM block. Copy
    each input block into its static channel window of the output block.
    """
    out_ref = refs[-1]
    in_refs = refs[:-1]
    for in_ref, off, sz in zip(in_refs, offsets, sizes):
        out_ref[:, pl.ds(off, sz), :] = in_ref[...]  # static start/size view


def _vmem_capacity_bytes():
    # Physical VMEM: 128 MiB on v5e/v6e, 64 MiB per TC on v7x.
    try:
        return int(pltpu.get_tpu_info().vmem_capacity_bytes)
    except Exception:
        return 64 * 1024 * 1024  # conservative (v7x) fallback


def _pick_minor_tile(minor, c_total, itemsize, target_block_bytes):
    """Largest multiple of 128 dividing `minor` whose output block stays under
    `target_block_bytes`. Falls back to the full minor dim when it is not
    128-divisible (block dim == full array dim is always legal)."""
    if minor < 128 or minor % 128 != 0:
        return minor
    best = 128
    t = 128
    while t <= minor:
        if minor % t == 0 and c_total * t * itemsize <= target_block_bytes:
            best = t
        t += 128
    return best


def concat_pallas(xs, dimension=1):
    """Equivalent of torch.cat(xs, dim=dimension) for same-dtype arrays."""
    xs = [jnp.asarray(x) for x in xs]
    assert len(xs) >= 1
    ndim = xs[0].ndim
    axis = dimension % ndim
    dtype = xs[0].dtype
    for x in xs:
        assert x.ndim == ndim, "all inputs must have the same rank"
        assert x.dtype == dtype, "torch.cat requires matching dtypes"
        for a in range(ndim):
            if a != axis:
                assert x.shape[a] == xs[0].shape[a], "non-concat dims must match"

    # Drop empty inputs (torch.cat permits them); trivial single-input case.
    xs = [x for x in xs if x.shape[axis] > 0] or xs[:1]
    if len(xs) == 1:
        return xs[0]

    sizes = tuple(int(x.shape[axis]) for x in xs)
    offsets = tuple(int(sum(sizes[:i])) for i in range(len(sizes)))
    c_total = int(sum(sizes))

    full_out_shape = list(xs[0].shape)
    full_out_shape[axis] = c_total
    full_out_shape = tuple(full_out_shape)

    # Canonical 3-D view (lead, concat, minor): keeps the concat axis off the
    # lane dim and makes the lane dim as wide as possible (H*W for NCHW, d=1).
    lead = int(math.prod(xs[0].shape[:axis]))
    minor = int(math.prod(xs[0].shape[axis + 1:]))
    xs3 = [x.reshape(lead, c, minor) for x, c in zip(xs, sizes)]
    # TODO(synk): if `axis` is the last dim (minor == 1) stores cannot be
    # lane-dense with this layout; correctness is preserved but bandwidth drops.

    itemsize = jnp.dtype(dtype).itemsize
    vmem_cap = _vmem_capacity_bytes()
    # ~2 MiB output blocks on v7x (64 MiB VMEM), ~4 MiB on v5e/v6e (128 MiB).
    target_block_bytes = max(vmem_cap // 32, 1 << 20)
    m_tile = _pick_minor_tile(minor, c_total, itemsize, target_block_bytes)
    num_m = minor // m_tile

    out_block_bytes = c_total * m_tile * itemsize
    # Per grid step: (sum of input blocks == output block) + output block,
    # each double-buffered by the auto pipeline -> ~4x the output block.
    per_step_bytes = 4 * out_block_bytes
    vmem_limit = max(2 * per_step_bytes, 32 * 1024 * 1024)
    vmem_limit = min(vmem_limit, (vmem_cap * 3) // 4)
    vmem_limit = int(max(vmem_limit, per_step_bytes + (2 << 20)))

    in_specs = [
        pl.BlockSpec((1, c, m_tile), lambda b, m: (b, 0, m)) for c in sizes
    ]
    out_spec = pl.BlockSpec((1, c_total, m_tile), lambda b, m: (b, 0, m))

    kernel = functools.partial(_concat_kernel, offsets=offsets, sizes=sizes)

    out3 = pl.pallas_call(
        kernel,
        out_shape=jax.ShapeDtypeStruct((lead, c_total, minor), dtype),
        grid=(lead, num_m),
        in_specs=in_specs,
        out_specs=out_spec,
        compiler_params=pltpu.CompilerParams(
            dimension_semantics=("parallel", "parallel"),
            vmem_limit_bytes=vmem_limit,
        ),
    )(*xs3)

    return out3.reshape(full_out_shape)


if __name__ == "__main__":
    key = jax.random.PRNGKey(0)
    k1, k2, k3 = jax.random.split(key, 3)

    # Small NCHW feature maps concatenated along channels (dim=1), as the
    # YOLOv5 `Concat` layer does for skip connections.
    x1 = jax.random.normal(k1, (2, 4, 16, 16), dtype=jnp.float32)
    x2 = jax.random.normal(k2, (2, 6, 16, 16), dtype=jnp.float32)
    x3 = jax.random.normal(k3, (2, 2, 16, 16), dtype=jnp.float32)

    out = concat_pallas([x1, x2, x3], dimension=1)
    out = jax.block_until_ready(out)

    ref = jnp.concatenate([x1, x2, x3], axis=1)
    assert out.shape == (2, 12, 16, 16), out.shape
    assert out.dtype == ref.dtype
    assert jnp.array_equal(out, ref), "mismatch vs jnp.concatenate reference"

    print("KERNEL_OK")
</pallas_src>

<mosaic_0001>
module attributes {stable_mosaic.version = 11 : i64} {
  func.func @_concat_kernel(%arg0: i32, %arg1: i32, %arg2: memref<1x4x256xf32, #tpu.memory_space<vmem>>, %arg3: memref<1x6x256xf32, #tpu.memory_space<vmem>>, %arg4: memref<1x2x256xf32, #tpu.memory_space<vmem>>, %arg5: memref<1x12x256xf32, #tpu.memory_space<vmem>>) attributes {dimension_semantics = [#tpu.dimension_semantics<parallel>, #tpu.dimension_semantics<parallel>], iteration_bounds = array<i64: 2, 1>, scalar_prefetch = 0 : i64, scratch_operands = 0 : i64, tpu.core_type = #tpu.core_type<tc>, window_params = [{transform_indices = @transform_0, window_bounds = array<i64: 1, 4, 256>}, {transform_indices = @transform_1, window_bounds = array<i64: 1, 6, 256>}, {transform_indices = @transform_2, window_bounds = array<i64: 1, 2, 256>}, {transform_indices = @transform_3, window_bounds = array<i64: 1, 12, 256>}]} {
    %c0 = arith.constant 0 : index
    %c0_0 = arith.constant 0 : index
    %c0_1 = arith.constant 0 : index
    %0 = vector.load %arg2[%c0, %c0_0, %c0_1] : memref<1x4x256xf32, #tpu.memory_space<vmem>>, vector<1x4x256xf32>
    %c0_2 = arith.constant 0 : index
    %c0_3 = arith.constant 0 : index
    %c0_4 = arith.constant 0 : index
    %1 = vector.load %arg5[%c0_2, %c0_3, %c0_4] : memref<1x12x256xf32, #tpu.memory_space<vmem>>, vector<1x4x256xf32>
    tpu.vector_store %arg5[%c0_2, %c0_3, %c0_4], %0 {strides = array<i32>} : memref<1x12x256xf32, #tpu.memory_space<vmem>>, vector<1x4x256xf32>,
    %c0_5 = arith.constant 0 : index
    %c0_6 = arith.constant 0 : index
    %c0_7 = arith.constant 0 : index
    %2 = vector.load %arg3[%c0_5, %c0_6, %c0_7] : memref<1x6x256xf32, #tpu.memory_space<vmem>>, vector<1x6x256xf32>
    %c0_8 = arith.constant 0 : index
    %c4 = arith.constant 4 : index
    %c0_9 = arith.constant 0 : index
    %3 = vector.load %arg5[%c0_8, %c4, %c0_9] : memref<1x12x256xf32, #tpu.memory_space<vmem>>, vector<1x6x256xf32>
    tpu.vector_store %arg5[%c0_8, %c4, %c0_9], %2 {strides = array<i32>} : memref<1x12x256xf32, #tpu.memory_space<vmem>>, vector<1x6x256xf32>,
    %c0_10 = arith.constant 0 : index
    %c0_11 = arith.constant 0 : index
    %c0_12 = arith.constant 0 : index
    %4 = vector.load %arg4[%c0_10, %c0_11, %c0_12] : memref<1x2x256xf32, #tpu.memory_space<vmem>>, vector<1x2x256xf32>
    %c0_13 = arith.constant 0 : index
    %c10 = arith.constant 10 : index
    %c0_14 = arith.constant 0 : index
    %5 = vector.load %arg5[%c0_13, %c10, %c0_14] : memref<1x12x256xf32, #tpu.memory_space<vmem>>, vector<1x2x256xf32>
    tpu.vector_store %arg5[%c0_13, %c10, %c0_14], %4 {strides = array<i32>} : memref<1x12x256xf32, #tpu.memory_space<vmem>>, vector<1x2x256xf32>,
    return
  }
  func.func @transform_0(%arg0: i32, %arg1: i32) -> (i32, i32, i32) {
    %c0_i32 = arith.constant 0 : i32
    %c0_i32_0 = arith.constant 0 : i32
    return %arg0, %c0_i32, %arg1 : i32, i32, i32
  }
  func.func @transform_1(%arg0: i32, %arg1: i32) -> (i32, i32, i32) {
    %c0_i32 = arith.constant 0 : i32
    %c0_i32_0 = arith.constant 0 : i32
    return %arg0, %c0_i32, %arg1 : i32, i32, i32
  }
  func.func @transform_2(%arg0: i32, %arg1: i32) -> (i32, i32, i32) {
    %c0_i32 = arith.constant 0 : i32
    %c0_i32_0 = arith.constant 0 : i32
    return %arg0, %c0_i32, %arg1 : i32, i32, i32
  }
  func.func @transform_3(%arg0: i32, %arg1: i32) -> (i32, i32, i32) {
    %c0_i32 = arith.constant 0 : i32
    %c0_i32_0 = arith.constant 0 : i32
    return %arg0, %c0_i32, %arg1 : i32, i32, i32
  }
}

</mosaic_0001>

<bundles_post_ra>
// kernel: tpu_custom_call.1
= control target key start
LH: loop header
LB: loop body
LE: loop exit
PB: predicated region body
PF: predicated region fallthrough
CT: control target
= control target key end

     0   :  { %s530_s12 = smov 0   ;;  %s532_s13 = smov 0   ;;  %s569_s0 = inlined_call_operand.vmem [shape: f32[2,4,256], index: 0, kind: input, shape index: {}]   ;;  %s570_s1 = inlined_call_operand.vmem [shape: f32[2,6,256], index: 1, kind: input, shape index: {}]   ;;  %s571_s2 = inlined_call_operand.vmem [shape: f32[2,2,256], index: 2, kind: input, shape index: {}]   ;;  %s572_s3 = inlined_call_operand.vmem [shape: f32[2,12,256], index: 3, kind: output, shape index: {}]  }
   0x1   :  { %s534_s14 = smov 0  }
   0x2 LB: > { %s25_s15 = sadd.s32 1, %s503_s13  ;;  %p442_p0 = scmp.ge.s32.totalorder %s507_s14, 1  ;;  %s507_s14 = sphi %s534_s14, %s13_s14   ;;  %s503_s13 = sphi %s532_s13, %s574_s13   ;;  %s499_s12 = sphi %s530_s12, %s573_s12  }
   0x3   : > { %p27_p1 = scmp.ge.s32.totalorder %s25_s15, 2  ;;  %p192_p2 = scmp.lt.s32.totalorder %s507_s14, 3 }
   0x5   : > { %s576_s15 = smov (%p27_p1, %s25_s15), 0  ;;  %p193_p3 = pnand %p442_p0, %p192_p2 }
   0x6   : > { %p243_p4 = scmp.lt.s32.totalorder (!%p193_p3), %s499_s12, 1 }
   0x7   : > { %196 = sbr.rel (%p193_p3) target bundleno = 24 (0x18), region = 32 }
   0xc   : > { %v306_v0 = vlaneseq  ;;  %v509_v1 = vmov 1983009808   ;;  %s578_s12 = smov (!%p243_p4, %s499_s12), 1 }
   0xd   : > { %v304_v2 = vunpack.c.l.s4 %v509_v1  ;;  %s454_s16 = sshll.u32 %s578_s12, 3  ;;  %s457_s17 = sshll.u32 %s578_s12, 5 }
   0xe   : > { %v307_v4 = vshrl.u32 %v306_v0, 7  ;;  %s250_s20 = scalar_lea.vmem %s569_s0, %s454_s16  ;;  %s280_s23 = scalar_lea.vmem %s572_s3, %s457_s17 }
   0xf   : > { %v305_v3 = vunpack.c.0.s8 %v304_v2  ;;  %v282_v5 = vld [vmem:[%s250_s20] sm:$0xff]  ;;  %s455_s24 = sshll.u32 %s578_s12, 4  ;;  %s456_s25 = sshll.u32 %s578_s12, 2 }
  0x10   : > { %286 = vst [vmem:[%s280_s23] sm:$0xf] %v282_v5  ;;  %v284_v6 = vcombine.high %v282_v5, %v282_v5  ;;  %s260_s28 = scalar_lea.vmem %s570_s1, %s455_s24  ;;  %s270_s4 = scalar_lea.vmem %s571_s2, %s456_s25 }
  0x11   : > { %v308_v7 = vsub.s32 %v305_v3, %v307_v4  ;;  %v288_v8 = vld [vmem:[%s260_s28] sm:$0x3f]  ;;  %v289_v9 = vld [vmem:[%s260_s28 + $0x8] sm:$0x3f] }
  0x12   : > { %287 = vst [vmem:[%s280_s23 + $0x8] sm:$0xf] %v284_v6  ;;  %v292_v10 = vrot.slane %v288_v8, 4  ;;  %v293_v11 = vrot.slane %v289_v9, 4  ;;  %v484_v12 = vld [vmem:[%s270_s4] ss:$0 sps:$4 sm:$0xff]  }
  0x13   : > { %451 = vst.sshfl [vmem:[%s280_s23 + $0x10] sm:$0x30 pattern:$0x76325410] %v484_v12  ;;  %v309_v13 = vrot.slane %v484_v12, %v308_v7 }
  0x14   : > { %296 = vst [vmem:[%s280_s23 + $0x10] ss:$-12 sps:$4 sm:$0xf3] %v292_v10   ;;  %297 = vst [vmem:[%s280_s23 + $0x18] ss:$-12 sps:$4 sm:$0xf3] %v293_v11  }
  0x15   : > { %v310_v14 = vcombine.high %v309_v13, %v309_v13 }
  0x17   : > { %314 = vst [vmem:[%s280_s23 + $0x18] sm:$0xc] %v310_v14 }
  0x18 PF: > { %s13_s14 = sadd.s32 1, %s507_s14   ;;  %s573_s12 = smov %s503_s13 }
  0x19   : > { %p10_p5 = scmp.ge.s32.totalorder %s13_s14, 4   ;;  %s574_s13 = smov %s576_s15 }
  0x1b   :  { %12 = sbr.rel (!%p10_p5) target bundleno = 2 (0x2), region = 68 }

</bundles_post_ra>
